<compile_context>
chip_gen: v7x
topology: tpu7x:2x2x1
jax: 0.10.0
libtpu: 0.0.40
codegen_flags: <defaults>
</compile_context>

<pallas_src>
import jax
import jax.numpy as jnp
from jax import lax
from jax.experimental import pallas as pl
from jax.experimental.pallas import tpu as pltpu

F_IN = 22   # layer1 input features
H = 2       # layer1 output features


def _round_up(n, m):
    return (n + m - 1) // m * m


def _choose_tile(batch, block_b):
    """Pick a lane-dense batch tile (multiple of 128) and pad the batch.

    Prefers >= 2 grid steps so v7x megacore can shard the "parallel" axis
    across both TensorCores (no-op on v5e/v6e).
    """
    b128 = _round_up(batch, 128)
    tb = max(128, min(_round_up(block_b, 128), b128))
    if b128 // tb < 2 and b128 >= 256:
        tb = _round_up(b128 // 2, 128)
    b_pad = _round_up(batch, tb)
    return tb, b_pad, b_pad // tb


def _mlp_kernel(s_ref, w0_ref, w1_ref, x_ref, o_ref):
    """One (F_IN, TB) batch tile.

    s_ref : (5,)      f32 SMEM  [b1_0, b1_1, w2_0, w2_1, b2] (scalar reads)
    w0_ref: (F_IN, 1) f32 VMEM  layer-1 weight column, hidden unit 0
    w1_ref: (F_IN, 1) f32 VMEM  layer-1 weight column, hidden unit 1
    x_ref : (F_IN, TB) f32 VMEM feature-major input tile (batch on lanes)
    o_ref : (1, TB)    f32 VMEM lane-dense output tile
    """
    tb = o_ref.shape[-1]
    # Largest of 512/256/128 that divides TB (TB is always a multiple of 128).
    if tb % 512 == 0:
        chunk = 512
    elif tb % 256 == 0:
        chunk = 256
    else:
        chunk = 128
    n_chunks = tb // chunk

    # Weight columns: (F_IN, 1), lane-broadcast inside the muls below.
    w0 = w0_ref[...]
    w1 = w1_ref[...]
    # Scalars from SMEM.
    b1_0 = s_ref[0]
    b1_1 = s_ref[1]
    w2_0 = s_ref[2]
    w2_1 = s_ref[3]
    b2 = s_ref[4]

    def body(c, carry):
        j = pl.multiple_of(c * chunk, chunk)
        xc = x_ref[:, pl.ds(j, chunk)]                        # (F_IN, chunk)
        # Layer 1: full-vreg elementwise mul (VPU) + cross-sublane reduce (XLU).
        h0 = jnp.sum(w0 * xc, axis=0, keepdims=True)          # (1, chunk)
        h1 = jnp.sum(w1 * xc, axis=0, keepdims=True)
        # Bias + ReLU + layer 2 epilogue: a few (1, chunk) VPU ops.
        h0 = jnp.maximum(h0 + b1_0, 0.0)
        h1 = jnp.maximum(h1 + b1_1, 0.0)
        o_ref[:, pl.ds(j, chunk)] = w2_0 * h0 + w2_1 * h1 + b2
        return carry

    lax.fori_loop(0, n_chunks, body, 0)


def prepare_params(params):
    """Split torch-shaped params ((2,22),(2,),(1,2),(1,)) into kernel operands."""
    w1, b1, w2, b2 = params
    w1 = jnp.asarray(w1, jnp.float32)
    b1 = jnp.reshape(jnp.asarray(b1, jnp.float32), (H,))
    w2 = jnp.reshape(jnp.asarray(w2, jnp.float32), (H,))
    b2 = jnp.reshape(jnp.asarray(b2, jnp.float32), (1,))
    w1c0 = jnp.reshape(w1[0], (F_IN, 1))     # VMEM weight column, unit 0
    w1c1 = jnp.reshape(w1[1], (F_IN, 1))     # VMEM weight column, unit 1
    scalars = jnp.concatenate([b1, w2, b2])  # (5,) SMEM scalars
    return scalars, w1c0, w1c1


def regressor_forward_fm(x_fm, prepared, *, block_b=16384):
    """Forward pass on a feature-major input.

    x_fm: (22, B) float32 — batch on the last (lane) axis.
    Returns (B,) float32, matching torch's .squeeze().
    """
    scalars, w1c0, w1c1 = prepared
    F, B = x_fm.shape
    assert F == F_IN, (F, F_IN)

    tb, b_pad, n_blocks = _choose_tile(B, block_b)
    if b_pad != B:
        x_fm = jnp.pad(x_fm, ((0, 0), (0, b_pad - B)))

    cost = pl.CostEstimate(
        flops=2 * b_pad * (F_IN * H + H),
        transcendentals=0,
        bytes_accessed=(F_IN + 1) * b_pad * 4 + (2 * F_IN + 5) * 4,
    )

    out = pl.pallas_call(
        _mlp_kernel,
        out_shape=jax.ShapeDtypeStruct((1, b_pad), jnp.float32),
        grid=(n_blocks,),
        in_specs=[
            # 5 scalars (b1, w2, b2): resident in SMEM.
            pl.BlockSpec(memory_space=pltpu.MemorySpace.SMEM),
            # Layer-1 weight columns: tiny VMEM operands, invariant across the
            # grid (constant index_map -> fetched once, kept resident).
            pl.BlockSpec((F_IN, 1), lambda i: (0, 0)),
            pl.BlockSpec((F_IN, 1), lambda i: (0, 0)),
            # One (22, TB) feature-major input tile per grid step.
            pl.BlockSpec((F_IN, tb), lambda i: (0, i)),
        ],
        # Lane-dense (1, TB) output tile -> unmasked full-width stores.
        out_specs=pl.BlockSpec((1, tb), lambda i: (0, i)),
        compiler_params=pltpu.CompilerParams(
            dimension_semantics=("parallel",),      # megacore on v7x
            vmem_limit_bytes=32 * 1024 * 1024,      # safe on v5e/v6e/v7x
        ),
        cost_estimate=cost,
    )(scalars, w1c0, w1c1, x_fm)

    return out[0, :B]


def regressor_forward(x, params, *, block_b=16384, min_kernel_batch=65536):
    """Torch-layout convenience wrapper: x is (B, 22), params torch-shaped.

    For small batches the fused pure-JAX expression beats any kernel launch,
    so this wrapper branches on batch size (review item 8).
    """
    w1, b1, w2, b2 = params
    if x.shape[0] < min_kernel_batch:
        h = jnp.maximum(x @ jnp.transpose(w1) + b1, 0.0)
        return jnp.squeeze(h @ jnp.transpose(w2) + b2)
    return regressor_forward_fm(jnp.transpose(x), prepare_params(params),
                                block_b=block_b)


def init_params(key):
    """Deterministic init mimicking nn.Linear's U(-1/sqrt(fan_in), 1/sqrt(fan_in)).

    Shapes match torch: w1 (2, 22), b1 (2,), w2 (1, 2), b2 (1,).
    """
    k1, k2, k3, k4 = jax.random.split(key, 4)
    bound1 = 1.0 / jnp.sqrt(float(F_IN))
    bound2 = 1.0 / jnp.sqrt(float(H))
    w1 = jax.random.uniform(k1, (H, F_IN), jnp.float32, -bound1, bound1)
    b1 = jax.random.uniform(k2, (H,), jnp.float32, -bound1, bound1)
    w2 = jax.random.uniform(k3, (1, H), jnp.float32, -bound2, bound2)
    b2 = jax.random.uniform(k4, (1,), jnp.float32, -bound2, bound2)
    return w1, b1, w2, b2


if __name__ == "__main__":
    key = jax.random.PRNGKey(0)
    pkey, xkey = jax.random.split(key)
    params = init_params(pkey)
    prepared = prepare_params(params)

    # Small example batch, produced directly in feature-major (F, B) layout so
    # no standalone transpose sits in front of the kernel.
    B = 2048
    x_fm = jax.random.normal(xkey, (F_IN, B), dtype=jnp.float32)

    # _choose_tile splits this into 2 grid steps of 1024 lanes each.
    y = regressor_forward_fm(x_fm, prepared)
    y = jax.block_until_ready(y)

    # Pure-JAX f32 reference (elementwise + sum, exact f32, no MXU precision
    # ambiguity), in torch layout.
    w1, b1, w2, b2 = params
    x_bf = x_fm.T                                              # (B, 22)
    h0 = jnp.maximum(jnp.sum(x_bf * w1[0], axis=1) + b1[0], 0.0)
    h1 = jnp.maximum(jnp.sum(x_bf * w1[1], axis=1) + b1[1], 0.0)
    ref = w2[0, 0] * h0 + w2[0, 1] * h1 + b2[0]

    assert y.shape == (B,), y.shape
    assert jnp.allclose(y, ref, atol=1e-5, rtol=1e-5), float(
        jnp.max(jnp.abs(y - ref)))

    print("KERNEL_OK")
</pallas_src>

<mosaic_0001>
module attributes {stable_mosaic.version = 11 : i64} {
  func.func @_mlp_kernel(%arg0: i32, %arg1: memref<5xf32, #tpu.memory_space<smem>>, %arg2: memref<22x1xf32, #tpu.memory_space<vmem>>, %arg3: memref<22x1xf32, #tpu.memory_space<vmem>>, %arg4: memref<22x1024xf32, #tpu.memory_space<vmem>>, %arg5: memref<1x1024xf32, #tpu.memory_space<vmem>>) attributes {dimension_semantics = [#tpu.dimension_semantics<parallel>], iteration_bounds = array<i64: 2>, scalar_prefetch = 0 : i64, scratch_operands = 0 : i64, tpu.core_type = #tpu.core_type<tc>, window_params = [{transform_indices = @transform_0, window_bounds = array<i64: 5>}, {pipeline_mode = #tpu.pipeline_mode<synchronous>, transform_indices = @transform_1, window_bounds = array<i64: 22, 1>}, {pipeline_mode = #tpu.pipeline_mode<synchronous>, transform_indices = @transform_2, window_bounds = array<i64: 22, 1>}, {transform_indices = @transform_3, window_bounds = array<i64: 22, 1024>}, {transform_indices = @transform_4, window_bounds = array<i64: 1, 1024>}]} {
    %c0 = arith.constant 0 : index
    %c0_0 = arith.constant 0 : index
    %0 = vector.load %arg2[%c0, %c0_0] : memref<22x1xf32, #tpu.memory_space<vmem>>, vector<22x1xf32>
    %c0_1 = arith.constant 0 : index
    %c0_2 = arith.constant 0 : index
    %1 = vector.load %arg3[%c0_1, %c0_2] : memref<22x1xf32, #tpu.memory_space<vmem>>, vector<22x1xf32>
    %c0_3 = arith.constant 0 : index
    %2 = memref.load %arg1[%c0_3] : memref<5xf32, #tpu.memory_space<smem>>
    %c1 = arith.constant 1 : index
    %3 = memref.load %arg1[%c1] : memref<5xf32, #tpu.memory_space<smem>>
    %c2 = arith.constant 2 : index
    %4 = memref.load %arg1[%c2] : memref<5xf32, #tpu.memory_space<smem>>
    %c3 = arith.constant 3 : index
    %5 = memref.load %arg1[%c3] : memref<5xf32, #tpu.memory_space<smem>>
    %c4 = arith.constant 4 : index
    %6 = memref.load %arg1[%c4] : memref<5xf32, #tpu.memory_space<smem>>
    %c0_i32 = arith.constant 0 : i32
    %c2_i32 = arith.constant 2 : i32
    %7 = arith.addi %c0_i32, %c2_i32 : i32
    %c1_i32 = arith.constant 1 : i32
    scf.for %arg6 = %c0_i32 to %7 step %c1_i32  : i32 {
      %c512_i32 = arith.constant 512 : i32
      %8 = arith.muli %arg6, %c512_i32 : i32
      %9 = tpu.assume_multiple %8, 512 : i32
      %c0_5 = arith.constant 0 : index
      %10 = arith.index_cast %9 : i32 to index
      %11 = vector.load %arg4[%c0_5, %10] : memref<22x1024xf32, #tpu.memory_space<vmem>>, vector<22x512xf32>
      %12 = vector.broadcast %0 : vector<22x1xf32> to vector<22x512xf32>
      %13 = arith.mulf %12, %11 : vector<22x512xf32>
      %cst = arith.constant dense<0.000000e+00> : vector<512xf32>
      %14 = vector.multi_reduction <add>, %13, %cst [0] : vector<22x512xf32> to vector<512xf32>
      %15 = vector.shape_cast %14 : vector<512xf32> to vector<1x512xf32>
      %16 = vector.broadcast %1 : vector<22x1xf32> to vector<22x512xf32>
      %17 = arith.mulf %16, %11 : vector<22x512xf32>
      %cst_6 = arith.constant dense<0.000000e+00> : vector<512xf32>
      %18 = vector.multi_reduction <add>, %17, %cst_6 [0] : vector<22x512xf32> to vector<512xf32>
      %19 = vector.shape_cast %18 : vector<512xf32> to vector<1x512xf32>
      %20 = vector.broadcast %2 : f32 to vector<1x512xf32>
      %21 = arith.addf %15, %20 : vector<1x512xf32>
      %cst_7 = arith.constant 0.000000e+00 : f32
      %22 = vector.broadcast %cst_7 : f32 to vector<1x512xf32>
      %23 = arith.maximumf %21, %22 : vector<1x512xf32>
      %24 = vector.broadcast %3 : f32 to vector<1x512xf32>
      %25 = arith.addf %19, %24 : vector<1x512xf32>
      %cst_8 = arith.constant 0.000000e+00 : f32
      %26 = vector.broadcast %cst_8 : f32 to vector<1x512xf32>
      %27 = arith.maximumf %25, %26 : vector<1x512xf32>
      %28 = vector.broadcast %4 : f32 to vector<1x512xf32>
      %29 = arith.mulf %28, %23 : vector<1x512xf32>
      %30 = vector.broadcast %5 : f32 to vector<1x512xf32>
      %31 = arith.mulf %30, %27 : vector<1x512xf32>
      %32 = arith.addf %29, %31 : vector<1x512xf32>
      %33 = vector.broadcast %6 : f32 to vector<1x512xf32>
      %34 = arith.addf %32, %33 : vector<1x512xf32>
      %c0_9 = arith.constant 0 : index
      %35 = arith.index_cast %9 : i32 to index
      %36 = vector.load %arg5[%c0_9, %35] : memref<1x1024xf32, #tpu.memory_space<vmem>>, vector<1x512xf32>
      tpu.vector_store %arg5[%c0_9, %35], %34 {strides = array<i32>} : memref<1x1024xf32, #tpu.memory_space<vmem>>, vector<1x512xf32>,
    }
    %c2_i32_4 = arith.constant 2 : i32
    return
  }
  func.func @transform_0(%arg0: i32) -> i32 {
    %c0_i32 = arith.constant 0 : i32
    %c0_i32_0 = arith.constant 0 : i32
    return %c0_i32 : i32
  }
  func.func @transform_1(%arg0: i32) -> (i32, i32) {
    %c0_i32 = arith.constant 0 : i32
    %c0_i32_0 = arith.constant 0 : i32
    %c0_i32_1 = arith.constant 0 : i32
    return %c0_i32, %c0_i32_0 : i32, i32
  }
  func.func @transform_2(%arg0: i32) -> (i32, i32) {
    %c0_i32 = arith.constant 0 : i32
    %c0_i32_0 = arith.constant 0 : i32
    %c0_i32_1 = arith.constant 0 : i32
    return %c0_i32, %c0_i32_0 : i32, i32
  }
  func.func @transform_3(%arg0: i32) -> (i32, i32) {
    %c0_i32 = arith.constant 0 : i32
    %c0_i32_0 = arith.constant 0 : i32
    return %c0_i32, %arg0 : i32, i32
  }
  func.func @transform_4(%arg0: i32) -> (i32, i32) {
    %c0_i32 = arith.constant 0 : i32
    %c0_i32_0 = arith.constant 0 : i32
    return %c0_i32, %arg0 : i32, i32
  }
}

</mosaic_0001>

<bundles_post_ra>
// kernel: tpu_custom_call.1
= control target key start
LH: loop header
LB: loop body
LE: loop exit
PB: predicated region body
PF: predicated region fallthrough
CT: control target
= control target key end

     0   :  { %9 = vsyncpa [#allocation5], 0  ;;  %s1128_s0 = inlined_call_operand.vmem [shape: f32[5], index: 0, kind: input, shape index: {}]   ;;  %s1129_s1 = inlined_call_operand.vmem [shape: f32[22,1], index: 1, kind: input, shape index: {}]   ;;  %s1130_s2 = inlined_call_operand.vmem [shape: f32[22,1], index: 2, kind: input, shape index: {}]   ;;  %s1131_s3 = inlined_call_operand.hbm [shape: f32[22,2048], index: 3, kind: input, shape index: {}]   ;;  %s1132_s4 = inlined_call_operand.hbm [shape: f32[1,2048], index: 4, kind: output, shape index: {}]  }
   0x1   :  { %10 = vsyncpa [#allocation3], 0 }
   0x2   :  { %12 = vsyncpa [#allocation3 + $0x1], 0 }
   0x3   :  { %13 = vsyncpa [#allocation4], 0 }
   0x4   :  { %15 = vsyncpa [#allocation4 + $0x1], 0  ;;  %s824_s15 = smov 0   ;;  %s826_s16 = smov 0  }
   0x5   :  { %s828_s17 = smov 0   ;;  %s830_s18 = smov 0  }
   0x6 LB: > { %s845_s19 = sadd.s32 4294967295, %s785_s18   ;;  %s570_s20 = sadd.s32 4294967294, %s785_s18   ;;  %s785_s18 = sphi %s830_s18, %s1152_s18   ;;  %s781_s17 = sphi %s828_s17, %s1151_s17   ;;  %s777_s16 = sphi %s826_s16, %s1150_s16   ;;  %s773_s15 = sphi %s824_s15, %s1149_s15  }
   0x7   : > { %s849_s21 = sadd.s32 1, %s785_s18   ;;  %s91_s22 = sadd.s32 1, %s781_s17 }
   0x8   : > { %s88_s23 = ssub.s32 %s785_s18, %s849_s21  ;;  %p98_p0 = scmp.ne.s32.totalorder %s781_s17, %s777_s16 }
   0x9   : > { %p89_p1 = scmp.eq.s32.totalorder %s88_s23, 0  ;;  %p99_p2 = scmp.eq.s32.totalorder %s785_s18, 0 }
   0xa   : > { %p104_p3 = scmp.ne.s32.totalorder %s777_s16, %s773_s15  ;;  %p1134_p4 = scmp.eq.s32.totalorder %s845_s19, 0 }
   0xb   : > { %s861_s24 = scalar_select %p89_p1, %s781_s17, %s91_s22  }
   0xc   : > { %p863_p5 = por %p99_p2, %p98_p0  ;;  %p869_p6 = por %p1134_p4, %p104_p3 }
   0xd   : > { %p128_p7 = scmp.eq.s32.totalorder %s845_s19, 1  ;;  %p134_p8 = scmp.eq.s32.totalorder %s570_s20, 1 }
   0xe   : > { %s1137_s26 = scalar_select %p869_p6, 1, 0 }
   0xf   : > { %p571_p9 = scmp.ge.s32.totalorder %s785_s18, 1  ;;  %p141_p10 = scmp.lt.s32.totalorder %s785_s18, 3 }
  0x10   : > { %p876_p11 = por %p128_p7, %p98_p0  ;;  %p880_p12 = por %p134_p8, %p104_p3 }
  0x11   : > { %p884_p13 = pnand %p571_p9, %p141_p10  ;;  %s154_s6 = sshll.u32 %s1128_s0, 4  ;;  %s155_s6 = int_to_ptr.vmem [resolvable:$true] %s154_s6 }
  0x12   : > { %s1138_s27 = scalar_select %p876_p11, 1, 0 }
  0x13   : > { %s1139_s28 = scalar_select %p880_p12, 1, 0 }
  0x14   : > { %p602_p1 = pneg %p884_p13  ;;  %p615_p2 = scmp.lt.s32.totalorder %s785_s18, 2 }
  0x15   : > { %s171_s8 = sand.u32 1, %s781_s17   ;;  %s666_s11 = scalar_lea.vmem %s155_s6, 16 }
  0x16   : > { %p897_p7 = pnand %p602_p1, %p1134_p4  ;;  %p904_p3 = pnand %p615_p2, %p863_p5 }
  0x17   : > { %s592_s10 = smul.u32 192, %s171_s8  ;;  %p667_p8 = scmp.ne.s32.totalorder %s155_s6, %s666_s11 }
  0x18   : > { %p668_p9 = pneg %p897_p7  ;;  %p674_p12 = scmp.lt.s32.totalorder %s155_s6, %s155_s6 }
  0x19   : > { %p675_p11 = scmp.lt.s32.totalorder %s666_s11, %s666_s11 }
  0x1a   : > { %p669_p10 = pnand %p668_p9, %p667_p8 }
  0x1b   : > { %p676_p1 = por %p675_p11, %p674_p12 }
  0x1c   : > { %p670_p0 = pneg %p669_p10 }
  0x1e   : > { %p677_p4 = pnand %p676_p1, %p670_p0 }
  0x20   : > { %680 = shalt.err (!%p677_p4)
}
  0x21   : > { %s791_s12 = smov [#allocation2]   ;;  %s590_s13 = sshll.u32 %s785_s18, 10 }
  0x22   : > { %605 = dma.vmem_to_smem (!%p897_p7), %s155_s6, 16, %s791_s12, [#allocation5]  }
  0x23   : > { %s175_s14 = scalar_lea.vmem [#allocation6], %s592_s10  ;;  %s916_s25 = scalar_lea.hbm %s1131_s3, %s590_s13 }
  0x24   : > { %s182_s20 = sshll.u32 %s175_s14, 4  ;;  %s920_s30 = scalar_lea.sflag [#allocation3], %s171_s8  ;;  %s918_s20 = int_to_ptr.vmem [resolvable:$true] %s182_s20 }
  0x25   : > { %s681_s5 = scalar_lea.hbm %s916_s25, 3072  ;;  %p683_p5 = pneg %p904_p3 }
  0x26   : > { %p682_p4 = scmp.ne.s32.totalorder %s916_s25, %s681_s5  ;;  %s686_s10 = scalar_lea.hbm %s1131_s3, 6144 }
  0x27   : > { %p687_p0 = scmp.lt.u32.totalorder %s916_s25, %s1131_s3  ;;  %p688_p2 = scmp.lt.u32.totalorder %s686_s10, %s681_s5 }
  0x28   : > { %p684_p11 = pnand %p683_p5, %p682_p4  ;;  %p690_p8 = scmp.lt.u32.totalorder %s681_s5, %s916_s25 }
  0x29   : > { %p689_p7 = por %p688_p2, %p687_p0 }
  0x2a   : > { %p685_p12 = pneg %p684_p11 }
  0x2b   : > { %p691_p9 = por %p690_p8, %p689_p7 }
  0x2d   : > { %p692_p10 = pnand %p691_p9, %p685_p12 }
  0x2f   : > { %695 = shalt.err (!%p692_p10)
}
  0x30   : > { %s696_s8 = scalar_lea.vmem %s918_s20, 3072  ;;  %s792_s13 = smov [#allocation6]  }
  0x31   : > { %p697_p1 = scmp.ne.s32.totalorder %s918_s20, %s696_s8  ;;  %s701_s14 = sshll.u32 %s792_s13, 4  ;;  %s702_s14 = int_to_ptr.vmem [resolvable:$false] %s701_s14 }
  0x32   : > { %s703_s22 = scalar_lea.vmem %s702_s14, 6144  ;;  %p704_p6 = scmp.lt.s32.totalorder %s918_s20, %s702_s14 }
  0x33   : > { %p699_p4 = pnand %p697_p1, %p683_p5  ;;  %p705_p0 = scmp.lt.s32.totalorder %s703_s22, %s696_s8 }
  0x35   : > { %p700_p11 = pneg %p699_p4  ;;  %p706_p2 = por %p705_p0, %p704_p6 }
  0x37   : > { %p707_p7 = pnand %p706_p2, %p700_p11 }
  0x39   : > { %710 = shalt.err (!%p707_p7)
}
  0x3a   : > { %s793_s23 = smov 2048   ;;  %s794_s5 = smov 1024  }
  0x3b   : > { %s795_s6 = smov 64   ;;  %194 = sbr.rel (%p884_p13) target bundleno = 275 (0x113), region = 36 }
  0x3c   : > { %609 = dma.hbm_to_vmem [thread:$0]  (!%p904_p3), %s916_s25, 3072, %s918_s20, %s920_s30, %s793_s23, %s794_s5, %s795_s6  }
  0x3d   : > { %p1143_p5 = scmp.eq.s32.totalorder (!%p884_p13), %s845_s19, 0 }
  0x42   : > { %760 = dma.done.wait (%p1143_p5), [#allocation5], 16   ;;  %p1144_p12 = pmov %p1143_p5 }
  0x43   : > { %s955_s7 = sand.u32 1, %s777_s16   ;;  %p1145_p6 = scmp.ne.s32.totalorder %s1137_s26, 0 }
  0x44   : > { %762 = vsyncadd (%p1144_p12), [#allocation5], 4294967280  ;;  %s593_s10 = smul.u32 192, %s955_s7  ;;  %s201_s11 = scalar_lea.sflag [#allocation3], %s955_s7 }
  0x46   : > { %s959_s12 = scalar_lea.vmem [#allocation6], %s593_s10 }
  0x47   : > { %764 = dma.done.wait (%p1145_p6), %s201_s11, 3072  }
  0x48   : > { %766 = vsyncadd (%p1145_p6), %s201_s11, 4294964224 }
  0x49   : > { %209 = sfence }
  0x4a   : > { %s578_s29 = sshll.u32 %s955_s7, 3  ;;  %v969_v0 = vld [vmem:[%s1129_s1] sm:$0xff]  ;;  %v974_v1 = vld [vmem:[%s1129_s1 + $0x8] sm:$0xff]  ;;  %v979_v2 = vld [vmem:[%s1129_s1 + $0x10] sm:$0x3f]  ;;  %s996_s10 = sld [smem:[#allocation2]] }
  0x4b   : > { %v984_v3 = vld [vmem:[%s1130_s2] sm:$0xff]  ;;  %v989_v4 = vld [vmem:[%s1130_s2 + $0x8] sm:$0xff]  ;;  %v994_v5 = vld [vmem:[%s1130_s2 + $0x10] sm:$0x3f]  ;;  %s998_s11 = sld [smem:[#allocation2 + $0x1]]  ;;  %s1000_s9 = sld [smem:[#allocation2 + $0x2]] }
  0x4c   : > { %s1002_s20 = sld [smem:[#allocation2 + $0x3]]  ;;  %s1004_s25 = sld [smem:[#allocation2 + $0x4]] }
  0x4d   : > { %s1006_s30 = scalar_lea.vmem [#allocation7], %s578_s29  ;;  %s1008_s8 = smov 0  }
  0x4e LB: >> { %v796_v6 = vmov 0   ;;  %s583_s29 = sshll.u32 %s789_s8, 9  ;;  %vm294_vm0 = vcmask 1045504   ;;  %v797_v21 = vmov 1966171168   ;;  %v439_v23 = vlaneseq  ;;  %s248_s8 = sadd.s32 1, %s789_s8   ;;  %s789_s8 = sphi %s1008_s8, %s248_s8  }
  0x4f   : >> { %665 = vset.pattern.permute.xlu1 %v796_v6  ;;  %664 = vset.pattern.permute.xlu0 %v796_v6  ;;  %s1020_s13 = sshra.s32 %s583_s29, 7  ;;  %v1046_v22 = vunpack.c.l.s4 %v797_v21  ;;  %p245_p13 = scmp.ge.s32.totalorder %s248_s8, 2  }
  0x50   : >> { %332 = vperm.xlu1 %665, %v984_v3   ;;  %268 = vperm.xlu0 %664, %v969_v0   ;;  %s584_s26 = sshll.u32 %s1020_s13, 3  ;;  %v1041_v19 = vstv %s996_s10  ;;  %vm462_vm1 = vcmp.lt.s32.totalorder %v439_v23, 512  ;;  %s459_s22 = scalar_lea.vmem %s1006_s30, %s1020_s13 [#allocation7] }
  0x51   : >> { %s1024_s14 = scalar_lea.vmem %s959_s12, %s584_s26 [#allocation6]  ;;  %v1033_v15 = vstv %s998_s11  ;;  %v1044_v20 = vstv %s1000_s9  ;;  %s591_s23 = sshll.u32 (%p245_p13), %s845_s19, 7 }
  0x52   : >> { %v254_v7 = vld [vmem:[%s1024_s14] sm:$0xff]  ;;  %v255_v9 = vld [vmem:[%s1024_s14 + $0x8] sm:$0xff]  ;;  %v256_v10 = vld [vmem:[%s1024_s14 + $0x10] sm:$0xff]  ;;  %v1036_v16 = vstv %s1002_s20  ;;  %s1089_s29 = scalar_lea.hbm (%p245_p13), %s1132_s4, %s591_s23  ;;  %s480_s26 = sshll.u32 (%p245_p13), %s1006_s30, 4  ;;  %s481_s26 = int_to_ptr.vmem [resolvable:$true] %s480_s26 }
  0x53   : >> { %v257_v11 = vld [vmem:[%s1024_s14 + $0x18] sm:$0xff]  ;;  %v258_v13 = vld [vmem:[%s1024_s14 + $0x40] sm:$0xff]  ;;  %v259_v14 = vld [vmem:[%s1024_s14 + $0x48] sm:$0xff]  ;;  %s466_s13 = scalar_lea.sflag (%p245_p13), [#allocation4], %s955_s7  ;;  %p1146_p8 = scmp.ne.s32.totalorder (%p245_p13), %s1138_s27, 0 }
  0x54   : >> { %337 = vperm.xlu1 %665, %v989_v4   ;;  %273 = vperm.xlu0 %664, %v974_v1   ;;  %v260_v17 = vld [vmem:[%s1024_s14 + $0x50] sm:$0xff]  ;;  %v261_v18 = vld [vmem:[%s1024_s14 + $0x58] sm:$0xff]  ;;  %v262_v38 = vld [vmem:[%s1024_s14 + $0x80] sm:$0x3f]  ;;  %s798_s8 = smov (%p245_p13), [#allocation7]  }
  0x55   : >> { %v263_v43 = vld [vmem:[%s1024_s14 + $0x88] sm:$0x3f]  ;;  %v264_v44 = vld [vmem:[%s1024_s14 + $0x90] sm:$0x3f]  ;;  %v265_v45 = vld [vmem:[%s1024_s14 + $0x98] sm:$0x3f] }
  0x56   : > { %s711_s14 = scalar_lea.vmem (%p245_p13), %s481_s26, 128 }
  0x57   : > { %p712_p3 = scmp.ne.s32.totalorder (%p245_p13), %s481_s26, %s711_s14 }
  0x58   : >> { %342 = vperm.xlu1 %665, %v994_v5   ;;  %278 = vperm.xlu0 %664, %v979_v2  }
  0x59   : > { %p713_p9 = pnand (%p245_p13), %p712_p3, %p1146_p8 }
  0x5b   : > { %p714_p10 = pneg (%p245_p13), %p713_p9 }
  0xcf   : >> { %v333_v8 = vpop.permute.xlu1 %332  ;;  %v269_v12 = vpop.permute.xlu0 %268 }
  0xd0   : >> { %v345_v24 = vmul.f32 %v333_v8, %v254_v7  ;;  %v346_v25 = vmul.f32 %v333_v8, %v255_v9  ;;  %v347_v26 = vmul.f32 %v333_v8, %v256_v10  ;;  %v348_v27 = vmul.f32 %v333_v8, %v257_v11 }
  0xd1   : >> { %v281_v28 = vmul.f32 %v269_v12, %v254_v7  ;;  %v282_v29 = vmul.f32 %v269_v12, %v255_v9  ;;  %v283_v30 = vmul.f32 %v269_v12, %v256_v10  ;;  %v284_v31 = vmul.f32 %v269_v12, %v257_v11 }
  0xd3   : >> { %v338_v32 = vpop.permute.xlu1 %337  ;;  %v274_v33 = vpop.permute.xlu0 %273 }
  0xd4   : >> { %v349_v34 = vmul.f32 %v338_v32, %v258_v13  ;;  %v350_v35 = vmul.f32 %v338_v32, %v259_v14  ;;  %v351_v36 = vmul.f32 %v338_v32, %v260_v17  ;;  %v352_v37 = vmul.f32 %v338_v32, %v261_v18 }
  0xd5   : >> { %v285_v39 = vmul.f32 %v274_v33, %v258_v13  ;;  %v286_v40 = vmul.f32 %v274_v33, %v259_v14  ;;  %v287_v41 = vmul.f32 %v274_v33, %v260_v17  ;;  %v288_v42 = vmul.f32 %v274_v33, %v261_v18 }
  0xd6   : >> { %v357_v46 = vadd.f32 %v349_v34, %v345_v24  ;;  %v366_v47 = vadd.f32 %v350_v35, %v346_v25  ;;  %v375_v48 = vadd.f32 %v351_v36, %v347_v26  ;;  %v384_v49 = vadd.f32 %v352_v37, %v348_v27 }
  0xd7   : >> { %v293_v50 = vadd.f32 %v285_v39, %v281_v28  ;;  %v303_v51 = vadd.f32 %v286_v40, %v282_v29  ;;  %v312_v52 = vadd.f32 %v287_v41, %v283_v30  ;;  %v321_v53 = vadd.f32 %v288_v42, %v284_v31  ;;  %v343_v54 = vpop.permute.xlu1 %342  ;;  %v279_v55 = vpop.permute.xlu0 %278 }
  0xd8   : >> { %v353_v56 = vmul.f32 %v343_v54, %v262_v38  ;;  %v354_v57 = vmul.f32 %v343_v54, %v263_v43  ;;  %v355_v58 = vmul.f32 %v343_v54, %v264_v44  ;;  %v356_v59 = vmul.f32 %v343_v54, %v265_v45 }
  0xd9   : >> { %v289_v60 = vmul.f32 %v279_v55, %v262_v38  ;;  %v290_v61 = vmul.f32 %v279_v55, %v263_v43  ;;  %v291_v62 = vmul.f32 %v279_v55, %v264_v44  ;;  %v292_v63 = vmul.f32 %v279_v55, %v265_v45 }
  0xda   : >> { %v358_v6 = vsel %vm294_vm0, %v353_v56, 0.0  ;;  %v367_v7 = vsel %vm294_vm0, %v354_v57, 0.0  ;;  %v376_v8 = vsel %vm294_vm0, %v355_v58, 0.0  ;;  %v385_v9 = vsel %vm294_vm0, %v356_v59, 0.0 }
  0xdb   : >> { %v359_v10 = vadd.f32 %v358_v6, %v357_v46  ;;  %v368_v11 = vadd.f32 %v367_v7, %v366_v47  ;;  %v377_v12 = vadd.f32 %v376_v8, %v375_v48  ;;  %v386_v13 = vadd.f32 %v385_v9, %v384_v49 }
  0xdc   : >> { %v295_v14 = vsel %vm294_vm0, %v289_v60, 0.0  ;;  %v304_v17 = vsel %vm294_vm0, %v290_v61, 0.0  ;;  %v313_v18 = vsel %vm294_vm0, %v291_v62, 0.0  ;;  %v322_v21 = vsel %vm294_vm0, %v292_v63, 0.0 }
  0xdd   : >> { %v360_v24 = vrot.slane %v359_v10, 4  ;;  %v369_v25 = vrot.slane %v368_v11, 4  ;;  %v378_v26 = vrot.slane %v377_v12, 4  ;;  %v387_v27 = vrot.slane %v386_v13, 4 }
  0xde   : >> { %v296_v28 = vadd.f32 %v295_v14, %v293_v50  ;;  %v305_v29 = vadd.f32 %v304_v17, %v303_v51  ;;  %v314_v30 = vadd.f32 %v313_v18, %v312_v52  ;;  %v323_v31 = vadd.f32 %v322_v21, %v321_v53 }
  0xdf   : >> { %v361_v32 = vadd.f32 %v360_v24, %v359_v10  ;;  %v370_v33 = vadd.f32 %v369_v25, %v368_v11  ;;  %v379_v34 = vadd.f32 %v378_v26, %v377_v12  ;;  %v388_v35 = vadd.f32 %v387_v27, %v386_v13 }
  0xe0   : >> { %v297_v36 = vrot.slane %v296_v28, 4  ;;  %v306_v37 = vrot.slane %v305_v29, 4  ;;  %v315_v38 = vrot.slane %v314_v30, 4  ;;  %v324_v39 = vrot.slane %v323_v31, 4 }
  0xe1   : >> { %v362_v40 = vrot.slane %v361_v32, 2  ;;  %v371_v41 = vrot.slane %v370_v33, 2  ;;  %v380_v42 = vrot.slane %v379_v34, 2  ;;  %v389_v43 = vrot.slane %v388_v35, 2 }
  0xe2   : >> { %v298_v44 = vadd.f32 %v297_v36, %v296_v28  ;;  %v307_v45 = vadd.f32 %v306_v37, %v305_v29  ;;  %v316_v46 = vadd.f32 %v315_v38, %v314_v30  ;;  %v325_v47 = vadd.f32 %v324_v39, %v323_v31 }
  0xe3   : >> { %v363_v48 = vadd.f32 %v362_v40, %v361_v32  ;;  %v372_v49 = vadd.f32 %v371_v41, %v370_v33  ;;  %v381_v50 = vadd.f32 %v380_v42, %v379_v34  ;;  %v390_v51 = vadd.f32 %v389_v43, %v388_v35 }
  0xe4   : >> { %v299_v52 = vrot.slane %v298_v44, 2  ;;  %v308_v53 = vrot.slane %v307_v45, 2  ;;  %v317_v54 = vrot.slane %v316_v46, 2  ;;  %v326_v55 = vrot.slane %v325_v47, 2 }
  0xe5   : >> { %v364_v56 = vrot.slane %v363_v48, 1  ;;  %v373_v57 = vrot.slane %v372_v49, 1  ;;  %v382_v58 = vrot.slane %v381_v50, 1  ;;  %v391_v59 = vrot.slane %v390_v51, 1 }
  0xe6   : >> { %v300_v60 = vadd.f32 %v299_v52, %v298_v44  ;;  %v309_v61 = vadd.f32 %v308_v53, %v307_v45  ;;  %v318_v62 = vadd.f32 %v317_v54, %v316_v46  ;;  %v327_v63 = vadd.f32 %v326_v55, %v325_v47 }
  0xe7   : >> { %v365_v6 = vadd.f32 %v364_v56, %v363_v48  ;;  %v374_v7 = vadd.f32 %v373_v57, %v372_v49  ;;  %v383_v8 = vadd.f32 %v382_v58, %v381_v50  ;;  %v392_v9 = vadd.f32 %v391_v59, %v390_v51 }
  0xe8   : >> { %v301_v10 = vrot.slane %v300_v60, 1  ;;  %v310_v11 = vrot.slane %v309_v61, 1  ;;  %v319_v12 = vrot.slane %v318_v62, 1  ;;  %v328_v13 = vrot.slane %v327_v63, 1 }
  0xe9   : >> { %v403_v14 = vadd.f32 %v1033_v15, %v365_v6  ;;  %v404_v17 = vadd.f32 %v1033_v15, %v374_v7  ;;  %v405_v18 = vadd.f32 %v1033_v15, %v383_v8  ;;  %v406_v21 = vadd.f32 %v1033_v15, %v392_v9 }
  0xea   : >> { %v302_v24 = vadd.f32 %v301_v10, %v300_v60  ;;  %v311_v25 = vadd.f32 %v310_v11, %v309_v61  ;;  %v320_v26 = vadd.f32 %v319_v12, %v318_v62  ;;  %v329_v27 = vadd.f32 %v328_v13, %v327_v63 }
  0xeb   : >> { %v407_v28 = vmax.f32 %v403_v14, 0.0  ;;  %v408_v29 = vmax.f32 %v404_v17, 0.0  ;;  %v409_v30 = vmax.f32 %v405_v18, 0.0  ;;  %v410_v31 = vmax.f32 %v406_v21, 0.0 }
  0xec   : >> { %v394_v32 = vadd.f32 %v1041_v19, %v302_v24  ;;  %v395_v33 = vadd.f32 %v1041_v19, %v311_v25  ;;  %v396_v34 = vadd.f32 %v1041_v19, %v320_v26  ;;  %v397_v35 = vadd.f32 %v1041_v19, %v329_v27 }
  0xed   : >> { %v417_v36 = vmul.f32 %v1036_v16, %v407_v28  ;;  %v418_v15 = vmul.f32 %v1036_v16, %v408_v29  ;;  %v419_v37 = vmul.f32 %v1036_v16, %v409_v30  ;;  %v420_v38 = vmul.f32 %v1036_v16, %v410_v31 }
  0xee   : >> { %v398_v39 = vmax.f32 %v394_v32, 0.0  ;;  %v399_v40 = vmax.f32 %v395_v33, 0.0  ;;  %v400_v41 = vmax.f32 %v396_v34, 0.0  ;;  %v401_v42 = vmax.f32 %v397_v35, 0.0 }
  0xef   : >> { %v438_v43 = vunpack.c.0.s8 %v1046_v22  ;;  %v440_v44 = vshrl.u32 %v439_v23, 7  ;;  %v425_v48 = vstv %s1004_s25 }
  0xf0   : >> { %v412_v45 = vmul.f32 %v1044_v20, %v398_v39  ;;  %v413_v19 = vmul.f32 %v1044_v20, %v399_v40  ;;  %v414_v46 = vmul.f32 %v1044_v20, %v400_v41  ;;  %v415_v47 = vmul.f32 %v1044_v20, %v401_v42 }
  0xf1   : >> { %v441_v52 = vsub.s32 %v438_v43, %v440_v44 }
  0xf2   : >> { %v421_v16 = vadd.f32 %v417_v36, %v412_v45  ;;  %v422_v49 = vadd.f32 %v418_v15, %v413_v19  ;;  %v423_v50 = vadd.f32 %v419_v37, %v414_v46  ;;  %v424_v51 = vadd.f32 %v420_v38, %v415_v47 }
  0xf4   : >> { %v426_v53 = vadd.f32 %v425_v48, %v421_v16  ;;  %v427_v22 = vadd.f32 %v425_v48, %v422_v49  ;;  %v428_v54 = vadd.f32 %v425_v48, %v423_v50  ;;  %v429_v55 = vadd.f32 %v425_v48, %v424_v51 }
  0xf6   : >> { %v434_v56 = vcombine.low %v426_v53, %v427_v22  ;;  %v435_v57 = vcombine.low %v428_v54, %v429_v55 }
  0xf8   : >> { %v442_v58 = vrot.slane %v434_v56, %v441_v52  ;;  %v449_v59 = vrot.slane %v435_v57, %v441_v52  ;;  %247 = sbr.rel (!%p245_p13) target bundleno = 78 (0x4e), region = 95 }
  0xfa   : >> { %v450_v60 = vcombine.low %v442_v58, %v449_v59 }
  0xfc   : >> { %v457_v20 = vrot.slane %v450_v60, %v441_v52 }
  0xfe   : >> { %464 = vst.msk [vmem:[%s459_s22] sm:$0xf] %vm462_vm1, %v457_v20  ;;  %s715_s22 = sshll.u32 (%p245_p13), %s798_s8, 4  ;;  %s716_s22 = int_to_ptr.vmem [resolvable:$false] %s715_s22 }
  0xff   : > { %s717_s12 = scalar_lea.vmem %s716_s22, 256  ;;  %p718_p1 = scmp.lt.s32.totalorder %s481_s26, %s716_s22 }
 0x100   : > { %p719_p4 = scmp.lt.s32.totalorder %s717_s12, %s711_s14 }
 0x102   : > { %p720_p11 = por %p719_p4, %p718_p1 }
 0x104   : > { %p721_p0 = pnand %p720_p11, %p714_p10 }
 0x106   : > { %724 = shalt.err (!%p721_p0)
}
 0x107   : > { %s725_s19 = scalar_lea.hbm %s1089_s29, 128  ;;  %s729_s11 = scalar_lea.hbm %s1132_s4, 256 }
 0x108   : > { %p726_p2 = scmp.ne.s32.totalorder %s1089_s29, %s725_s19  ;;  %p730_p12 = scmp.lt.u32.totalorder %s1089_s29, %s1132_s4 }
 0x109   : > { %p731_p6 = scmp.lt.u32.totalorder %s729_s11, %s725_s19  ;;  %p733_p3 = scmp.lt.u32.totalorder %s725_s19, %s1089_s29 }
 0x10a   : > { %p727_p7 = pnand %p726_p2, %p1146_p8 }
 0x10b   : > { %p732_p13 = por %p731_p6, %p730_p12 }
 0x10c   : > { %p728_p5 = pneg %p727_p7 }
 0x10d   : > { %p734_p9 = por %p733_p3, %p732_p13 }
 0x10f   : > { %p735_p10 = pnand %p734_p9, %p728_p5 }
 0x111   : > { %738 = shalt.err (!%p735_p10)
}
 0x112   : > { %600 = dma.vmem_to_hbm [thread:$0]  (%p1146_p8), %s481_s26, 128, %s1089_s29, %s466_s13  }
 0x113 PF: > { %s492_s25 = sand.u32 1, %s773_s15   ;;  %p1147_p1 = scmp.ne.s32.totalorder %s1139_s28, 0 }
 0x114   : > { %p1148_p4 = scmp.ge.s32.totalorder %s785_s18, 2  ;;  %s493_s30 = scalar_lea.sflag [#allocation4], %s492_s25 }
 0x116   : > { %p611_p11 = pnand %p1148_p4, %p1147_p1 }
 0x118   : > { %768 = dma.done.wait (!%p611_p11), %s493_s30, 128  }
 0x119   : > { %770 = vsyncadd (!%p611_p11), %s493_s30, 4294967168  ;;  %p18_p0 = scmp.ge.s32.totalorder %s849_s21, 4   ;;  %s1149_s15 = smov %s777_s16 }
 0x11a   : > { %s1150_s16 = smov %s781_s17  ;;  %s1151_s17 = smov %s861_s24 }
 0x11b   : > { %s1152_s18 = smov %s849_s21  ;;  %20 = sbr.rel (!%p18_p0) target bundleno = 6 (0x6), region = 106 }
 0x122   :  { %498 = vsyncpa [#allocation3], 1 }
 0x123   :  { %500 = vsyncpa [#allocation3 + $0x1], 1 }
 0x124   :  { %501 = vsyncpa [#allocation4], 1 }
 0x125   :  { %503 = vsyncpa [#allocation4 + $0x1], 1 }
 0x126   :  { %504 = vsyncpa [#allocation5], 1 }
 0x127   :  { %506 = vsyncpa [#allocation5 + $0x1], 1 }

</bundles_post_ra>
